<compile_context>
chip_gen: v6e
topology: v6e:2x2x1
jax: 0.10.0
libtpu: 0.0.40
codegen_flags: <defaults>
</compile_context>

<pallas_src>
import functools

import jax
import jax.numpy as jnp
from jax.experimental import pallas as pl
from jax.experimental.pallas import tpu as pltpu


def _attention_kernel(q_ref, k_ref, v_ref, w_ref, o_ref, *,
                      mxu_dtype, approx_recip, fuse_proj):
    nb, S, D = q_ref.shape
    _, T, _ = k_ref.shape

    # Fused, pre-transposed weights: (D, 3D) = [Wq.T * 1/sqrt(D) | Wk.T | Wv.T]
    w = w_ref[...].astype(mxu_dtype)

    # Flatten the batch block into rows so the projections see nb*S / nb*T rows.
    q2 = q_ref[...].reshape(nb * S, D).astype(mxu_dtype)
    k2 = k_ref[...].reshape(nb * T, D).astype(mxu_dtype)
    v2 = v_ref[...].reshape(nb * T, D).astype(mxu_dtype)

    if fuse_proj:
        # One MXU matmul for all three projections (computes 3x3 block products
        # and keeps the diagonal blocks).  Wins when D is small enough that the
        # individual matmuls would each be MXU fill/drain dominated.
        x = jnp.concatenate([q2, k2, v2], axis=0)                 # (nb*(S+2T), D)
        proj = jnp.dot(x, w, preferred_element_type=jnp.float32)  # (nb*(S+2T), 3D)
        qp = proj[:nb * S, 0:D].reshape(nb, S, D)
        kp = proj[nb * S:nb * (S + T), D:2 * D].reshape(nb, T, D)
        vp = proj[nb * (S + T):, 2 * D:3 * D].reshape(nb, T, D)
    else:
        # Large D: skip the 3x-FLOP fused trick, keep three transpose-free dots.
        qp = jnp.dot(q2, w[:, 0:D],
                     preferred_element_type=jnp.float32).reshape(nb, S, D)
        kp = jnp.dot(k2, w[:, D:2 * D],
                     preferred_element_type=jnp.float32).reshape(nb, T, D)
        vp = jnp.dot(v2, w[:, 2 * D:3 * D],
                     preferred_element_type=jnp.float32).reshape(nb, T, D)

    # Scores: batched contraction over the last axes (no transposed copies).
    # The 1/sqrt(D) scale is already folded into the Wq columns.
    scores = jnp.einsum('bsd,btd->bst',
                        qp.astype(mxu_dtype), kp.astype(mxu_dtype),
                        preferred_element_type=jnp.float32)       # (nb, S, T)

    # Numerically-stable softmax, kept in f32 (VPU/EUP path; v5e-safe).
    m = jnp.max(scores, axis=-1, keepdims=True)
    e = jnp.exp(scores - m)
    denom = jnp.sum(e, axis=-1, keepdims=True)
    p = e * pl.reciprocal(denom, approx=approx_recip)

    # Dropout(p=0.01) -> identity in eval mode.
    out = jnp.einsum('bst,btd->bsd',
                     p.astype(mxu_dtype), vp.astype(mxu_dtype),
                     preferred_element_type=jnp.float32)          # (nb, S, D)
    o_ref[...] = out.astype(o_ref.dtype)


def attention_layer(query, key, value, wq, wk, wv, *,
                    mxu_dtype=jnp.bfloat16, approx_recip=True, block_n=8):
    """Pallas-backed forward of AttentionLayer (attn_mask=None, eval mode)."""
    N, S, D = query.shape
    _, T, _ = key.shape
    assert key.shape == value.shape
    assert wq.shape == wk.shape == wv.shape == (D, D)

    # Batch-block size: largest divisor of N that is <= block_n.
    nb = 1
    for c in range(1, min(block_n, N) + 1):
        if N % c == 0:
            nb = c
    grid = (N // nb,)

    # Build the fused projection weight once in the wrapper (layout plumbing):
    # nn.Linear applies x @ W.T, so pre-transpose to (in, out) and pack the
    # three projections column-wise; fold the 1/sqrt(D) scale into Wq.
    scale = 1.0 / (float(D) ** 0.5)          # num_heads == 1
    w_fused = jnp.concatenate([wq.T * scale, wk.T, wv.T], axis=1)   # (D, 3D)

    fuse_proj = D <= 256
    kernel = functools.partial(_attention_kernel,
                               mxu_dtype=mxu_dtype,
                               approx_recip=approx_recip,
                               fuse_proj=fuse_proj)

    q_spec = pl.BlockSpec((nb, S, D), lambda n: (n, 0, 0))
    kv_spec = pl.BlockSpec((nb, T, D), lambda n: (n, 0, 0))
    w_spec = pl.BlockSpec((D, 3 * D), lambda n: (0, 0))
    o_spec = pl.BlockSpec((nb, S, D), lambda n: (n, 0, 0))

    # Explicit VMEM budget: double-buffered activation blocks + weights +
    # f32 intermediates, clamped to a range safe on v5e/v6e/v7x.
    itemsize = query.dtype.itemsize
    act_bytes = (2 * nb * S * D + 2 * nb * T * D) * itemsize           # q,out,k,v blocks
    w_bytes = D * 3 * D * w_fused.dtype.itemsize
    interm_bytes = (nb * (S + 2 * T) * 3 * D + nb * S * T
                    + 3 * nb * max(S, T) * D) * 4
    vmem_limit = int(min(64 << 20,
                         max(16 << 20,
                             2 * act_bytes + 2 * w_bytes + 2 * interm_bytes)))

    return pl.pallas_call(
        kernel,
        out_shape=jax.ShapeDtypeStruct((N, S, D), query.dtype),
        grid_spec=pltpu.PrefetchScalarGridSpec(
            num_scalar_prefetch=0,
            grid=grid,
            in_specs=[q_spec, kv_spec, kv_spec, w_spec],
            out_specs=o_spec,
        ),
        compiler_params=pltpu.CompilerParams(
            dimension_semantics=("parallel",),
            vmem_limit_bytes=vmem_limit,
        ),
    )(query, key, value, w_fused)


def _reference(query, key, value, wq, wk, wv):
    # Pure-JAX reference matching the intended PyTorch semantics.
    qp = query @ wq.T
    kp = key @ wk.T
    vp = value @ wv.T
    d = query.shape[-1]
    scores = qp @ jnp.swapaxes(kp, -1, -2) / (d ** 0.5)
    p = jax.nn.softmax(scores, axis=-1)
    return p @ vp


if __name__ == "__main__":
    # Small, deterministic shapes: batch N=2, seq S=T=8, embed_dim D=32.
    N, S, T, D = 2, 8, 8, 32
    key0 = jax.random.PRNGKey(0)
    k1, k2, k3, k4, k5, k6 = jax.random.split(key0, 6)

    query = jax.random.normal(k1, (N, S, D), dtype=jnp.float32)
    key_in = jax.random.normal(k2, (N, T, D), dtype=jnp.float32)
    value = jax.random.normal(k3, (N, T, D), dtype=jnp.float32)

    # nn.Linear(embed_dim, embed_dim, bias=False) weights, shape (out, in).
    bound = 1.0 / (D ** 0.5)
    wq = jax.random.uniform(k4, (D, D), jnp.float32, -bound, bound)
    wk = jax.random.uniform(k5, (D, D), jnp.float32, -bound, bound)
    wv = jax.random.uniform(k6, (D, D), jnp.float32, -bound, bound)

    ref = _reference(query, key_in, value, wq, wk, wv)

    # 1) Validation path: f32 MXU operands + exact reciprocal, tight tolerance.
    out_exact = attention_layer(query, key_in, value, wq, wk, wv,
                                mxu_dtype=jnp.float32, approx_recip=False)
    out_exact = jax.block_until_ready(out_exact)
    assert out_exact.shape == (N, S, D)
    assert jnp.allclose(out_exact, ref, atol=1e-4, rtol=1e-4)

    # 2) Performance path (default): bf16 MXU operands (f32 accumulation) +
    #    approx EUP reciprocal.  Tolerance deliberately relaxed for bf16.
    out_fast = attention_layer(query, key_in, value, wq, wk, wv)
    out_fast = jax.block_until_ready(out_fast)
    assert out_fast.shape == (N, S, D)
    assert jnp.allclose(out_fast.astype(jnp.float32), ref, atol=5e-2, rtol=5e-2)

    print("KERNEL_OK")
</pallas_src>

<mosaic_0001>
module attributes {stable_mosaic.version = 11 : i64} {
  func.func @_attention_kernel(%arg0: i32, %arg1: memref<2x8x32xf32, #tpu.memory_space<vmem>>, %arg2: memref<2x8x32xf32, #tpu.memory_space<vmem>>, %arg3: memref<2x8x32xf32, #tpu.memory_space<vmem>>, %arg4: memref<32x96xf32, #tpu.memory_space<vmem>>, %arg5: memref<2x8x32xf32, #tpu.memory_space<vmem>>) attributes {dimension_semantics = [#tpu.dimension_semantics<parallel>], iteration_bounds = array<i64: 1>, scalar_prefetch = 0 : i64, scratch_operands = 0 : i64, tpu.core_type = #tpu.core_type<tc>, window_params = [{transform_indices = @transform_0, window_bounds = array<i64: 2, 8, 32>}, {transform_indices = @transform_1, window_bounds = array<i64: 2, 8, 32>}, {transform_indices = @transform_2, window_bounds = array<i64: 2, 8, 32>}, {pipeline_mode = #tpu.pipeline_mode<synchronous>, transform_indices = @transform_3, window_bounds = array<i64: 32, 96>}, {transform_indices = @transform_4, window_bounds = array<i64: 2, 8, 32>}]} {
    %c0 = arith.constant 0 : index
    %c0_0 = arith.constant 0 : index
    %0 = vector.load %arg4[%c0, %c0_0] : memref<32x96xf32, #tpu.memory_space<vmem>>, vector<32x96xf32>
    %c0_1 = arith.constant 0 : index
    %c0_2 = arith.constant 0 : index
    %c0_3 = arith.constant 0 : index
    %1 = vector.load %arg1[%c0_1, %c0_2, %c0_3] : memref<2x8x32xf32, #tpu.memory_space<vmem>>, vector<2x8x32xf32>
    %2 = vector.shape_cast %1 : vector<2x8x32xf32> to vector<16x32xf32>
    %c0_4 = arith.constant 0 : index
    %c0_5 = arith.constant 0 : index
    %c0_6 = arith.constant 0 : index
    %3 = vector.load %arg2[%c0_4, %c0_5, %c0_6] : memref<2x8x32xf32, #tpu.memory_space<vmem>>, vector<2x8x32xf32>
    %4 = vector.shape_cast %3 : vector<2x8x32xf32> to vector<16x32xf32>
    %c0_7 = arith.constant 0 : index
    %c0_8 = arith.constant 0 : index
    %c0_9 = arith.constant 0 : index
    %5 = vector.load %arg3[%c0_7, %c0_8, %c0_9] : memref<2x8x32xf32, #tpu.memory_space<vmem>>, vector<2x8x32xf32>
    %6 = vector.shape_cast %5 : vector<2x8x32xf32> to vector<16x32xf32>
    %7 = tpu.concatenate %2, %4, %6 in 0 : vector<16x32xf32>, vector<16x32xf32>, vector<16x32xf32> -> vector<48x32xf32>
    %cst = arith.constant dense<0.000000e+00> : vector<48x96xf32>
    %8 = tpu.matmul %7, %0, %cst {dimension_numbers = #tpu.dot_dimension_numbers<[1], [0], [0], [1], [0, 0, 1, 1], [], []>} : vector<48x32xf32>, vector<32x96xf32>, vector<48x96xf32> -> vector<48x96xf32>
    %9 = vector.extract_strided_slice %8 {offsets = [0, 0], sizes = [16, 32], strides = [1, 1]} : vector<48x96xf32> to vector<16x32xf32>
    %10 = vector.shape_cast %9 : vector<16x32xf32> to vector<2x8x32xf32>
    %11 = vector.extract_strided_slice %8 {offsets = [16, 32], sizes = [16, 32], strides = [1, 1]} : vector<48x96xf32> to vector<16x32xf32>
    %12 = vector.shape_cast %11 : vector<16x32xf32> to vector<2x8x32xf32>
    %13 = vector.extract_strided_slice %8 {offsets = [32, 64], sizes = [16, 32], strides = [1, 1]} : vector<48x96xf32> to vector<16x32xf32>
    %14 = vector.shape_cast %13 : vector<16x32xf32> to vector<2x8x32xf32>
    "tpu.trace_start"() <{level = 10 : i32, message = "bsd,btd->bst"}> : () -> ()
    %cst_10 = arith.constant dense<0.000000e+00> : vector<2x8x8xf32>
    %15 = tpu.matmul %10, %12, %cst_10 {dimension_numbers = #tpu.dot_dimension_numbers<[2], [2], [1], [1], [0, 0, 0, 1, 1, 1], [0], [0]>} : vector<2x8x32xf32>, vector<2x8x32xf32>, vector<2x8x8xf32> -> vector<2x8x8xf32>
    "tpu.trace_stop"() : () -> ()
    %cst_11 = arith.constant dense<0xFF800000> : vector<2x8xf32>
    %16 = vector.multi_reduction <maximumf>, %15, %cst_11 [2] : vector<2x8x8xf32> to vector<2x8xf32>
    %17 = vector.shape_cast %16 : vector<2x8xf32> to vector<2x8x1xf32>
    %18 = vector.broadcast %17 : vector<2x8x1xf32> to vector<2x8x8xf32>
    %19 = arith.subf %15, %18 : vector<2x8x8xf32>
    %20 = math.exp %19 : vector<2x8x8xf32>
    %cst_12 = arith.constant dense<0.000000e+00> : vector<2x8xf32>
    %21 = vector.multi_reduction <add>, %20, %cst_12 [2] : vector<2x8x8xf32> to vector<2x8xf32>
    %22 = vector.shape_cast %21 : vector<2x8xf32> to vector<2x8x1xf32>
    %23 = tpu.reciprocal %22 : vector<2x8x1xf32> -> vector<2x8x1xf32>
    %24 = vector.broadcast %23 : vector<2x8x1xf32> to vector<2x8x8xf32>
    %25 = arith.mulf %20, %24 : vector<2x8x8xf32>
    "tpu.trace_start"() <{level = 10 : i32, message = "bst,btd->bsd"}> : () -> ()
    %cst_13 = arith.constant dense<0.000000e+00> : vector<2x8x32xf32>
    %26 = tpu.matmul %25, %14, %cst_13 {dimension_numbers = #tpu.dot_dimension_numbers<[2], [1], [1], [2], [0, 0, 0, 1, 1, 2], [0], [0]>} : vector<2x8x8xf32>, vector<2x8x32xf32>, vector<2x8x32xf32> -> vector<2x8x32xf32>
    "tpu.trace_stop"() : () -> ()
    %c0_14 = arith.constant 0 : index
    %c0_15 = arith.constant 0 : index
    %c0_16 = arith.constant 0 : index
    %27 = vector.load %arg5[%c0_14, %c0_15, %c0_16] : memref<2x8x32xf32, #tpu.memory_space<vmem>>, vector<2x8x32xf32>
    tpu.vector_store %arg5[%c0_14, %c0_15, %c0_16], %26 {strides = array<i32>} : memref<2x8x32xf32, #tpu.memory_space<vmem>>, vector<2x8x32xf32>,
    return
  }
  func.func @transform_0(%arg0: i32) -> (i32, i32, i32) {
    %c0_i32 = arith.constant 0 : i32
    %c0_i32_0 = arith.constant 0 : i32
    %c0_i32_1 = arith.constant 0 : i32
    return %arg0, %c0_i32, %c0_i32_0 : i32, i32, i32
  }
  func.func @transform_1(%arg0: i32) -> (i32, i32, i32) {
    %c0_i32 = arith.constant 0 : i32
    %c0_i32_0 = arith.constant 0 : i32
    %c0_i32_1 = arith.constant 0 : i32
    return %arg0, %c0_i32, %c0_i32_0 : i32, i32, i32
  }
  func.func @transform_2(%arg0: i32) -> (i32, i32, i32) {
    %c0_i32 = arith.constant 0 : i32
    %c0_i32_0 = arith.constant 0 : i32
    %c0_i32_1 = arith.constant 0 : i32
    return %arg0, %c0_i32, %c0_i32_0 : i32, i32, i32
  }
  func.func @transform_3(%arg0: i32) -> (i32, i32) {
    %c0_i32 = arith.constant 0 : i32
    %c0_i32_0 = arith.constant 0 : i32
    %c0_i32_1 = arith.constant 0 : i32
    return %c0_i32, %c0_i32_0 : i32, i32
  }
  func.func @transform_4(%arg0: i32) -> (i32, i32, i32) {
    %c0_i32 = arith.constant 0 : i32
    %c0_i32_0 = arith.constant 0 : i32
    %c0_i32_1 = arith.constant 0 : i32
    return %arg0, %c0_i32, %c0_i32_0 : i32, i32, i32
  }
}

</mosaic_0001>

<bundles_post_ra>
// kernel: tpu_custom_call.1
= control target key start
LH: loop header
LB: loop body
LE: loop exit
PB: predicated region body
PF: predicated region fallthrough
CT: control target
= control target key end

     0   :  { %9 = vsyncpa [#allocation3], 0  ;;  %s841_s0 = inlined_call_operand.hbm [shape: f32[2,8,32], index: 0, kind: input, shape index: {}]   ;;  %s842_s1 = inlined_call_operand.hbm [shape: f32[2,8,32], index: 1, kind: input, shape index: {}]   ;;  %s843_s2 = inlined_call_operand.hbm [shape: f32[2,8,32], index: 2, kind: input, shape index: {}]   ;;  %s844_s3 = inlined_call_operand.hbm [shape: f32[32,96], index: 3, kind: input, shape index: {}]   ;;  %s845_s4 = inlined_call_operand.hbm [shape: f32[2,8,32], index: 4, kind: output, shape index: {}]  }
   0x1   :  { %10 = vsyncpa [#allocation6], 0 }
   0x2   :  { %11 = vsyncpa [#allocation9], 0 }
   0x3   :  { %12 = vsyncpa [#allocation4], 0  ;;  %s745_s15 = smov [#allocation5]   ;;  %s746_s17 = smov [#allocation2]  }
   0x4   :  { %s30_s16 = sshll.u32 %s745_s15, 4  ;;  %s18_s18 = sshll.u32 %s746_s17, 4  ;;  %s31_s16 = int_to_ptr.vmem [resolvable:$true] %s30_s16  ;;  %s19_s18 = int_to_ptr.vmem [resolvable:$true] %s18_s18 }
   0x5   :  { %s645_s19 = scalar_lea.vmem %s31_s16, 256  ;;  %p650_p1 = scmp.lt.s32.totalorder %s31_s16, %s31_s16 }
   0x6   :  { %p646_p0 = scmp.ne.s32.totalorder %s31_s16, %s645_s19  ;;  %p651_p2 = scmp.lt.s32.totalorder %s645_s19, %s645_s19 }
   0x8   :  { %p652_p3 = por %p651_p2, %p650_p1 }
   0xa   :  { %p653_p4 = pnand %p652_p3, %p646_p0 }
   0xc   :  { %656 = shalt.err (!%p653_p4)
}
   0xd   :  { %s747_s20 = smov 128   ;;  %s748_s21 = smov 8  }
   0xe   :  { %36 = dma.hbm_to_vmem [thread:$0]  %s842_s1, 256, %s31_s16, [#allocation6], %s747_s20, %s747_s20, %s748_s21  }
   0xf   :  { %s665_s24 = scalar_lea.vmem %s19_s18, 256  ;;  %p670_p6 = scmp.lt.s32.totalorder %s19_s18, %s19_s18 }
  0x10   :  { %p666_p5 = scmp.ne.s32.totalorder %s19_s18, %s665_s24  ;;  %p671_p7 = scmp.lt.s32.totalorder %s665_s24, %s665_s24 }
  0x12   :  { %p672_p8 = por %p671_p7, %p670_p6 }
  0x14   :  { %p673_p9 = pnand %p672_p8, %p666_p5 }
  0x16   :  { %676 = shalt.err (!%p673_p9)
}
  0x17   :  { %24 = dma.hbm_to_vmem [thread:$0]  %s841_s0, 256, %s19_s18, [#allocation3], %s747_s20, %s747_s20, %s748_s21  }
  0x18   :  { %s749_s27 = smov [#allocation7]   ;;  %s750_s29 = smov [#allocation8]  }
  0x19   :  { %s42_s28 = sshll.u32 %s749_s27, 4  ;;  %s54_s30 = sshll.u32 %s750_s29, 4  ;;  %s43_s28 = int_to_ptr.vmem [resolvable:$true] %s42_s28  ;;  %s55_s30 = int_to_ptr.vmem [resolvable:$true] %s54_s30 }
  0x1a   :  { %s685_s1 = scalar_lea.vmem %s43_s28, 256  ;;  %p690_p11 = scmp.lt.s32.totalorder %s43_s28, %s43_s28 }
  0x1b   :  { %p686_p10 = scmp.ne.s32.totalorder %s43_s28, %s685_s1  ;;  %p691_p12 = scmp.lt.s32.totalorder %s685_s1, %s685_s1 }
  0x1d   :  { %p692_p13 = por %p691_p12, %p690_p11 }
  0x1f   :  { %p693_p0 = pnand %p692_p13, %p686_p10 }
  0x21   :  { %696 = shalt.err (!%p693_p0)
}
  0x22   :  { %48 = dma.hbm_to_vmem [thread:$0]  %s843_s2, 256, %s43_s28, [#allocation6], %s747_s20, %s747_s20, %s748_s21  }
  0x23   :  { %s705_s0 = scalar_lea.vmem %s55_s30, 512  ;;  %p710_p2 = scmp.lt.s32.totalorder %s55_s30, %s55_s30 }
  0x24   :  { %p706_p1 = scmp.ne.s32.totalorder %s55_s30, %s705_s0  ;;  %p711_p3 = scmp.lt.s32.totalorder %s705_s0, %s705_s0 }
  0x26   :  { %p712_p4 = por %p711_p3, %p710_p2 }
  0x28   :  { %p713_p5 = pnand %p712_p4, %p706_p1 }
  0x2a   :  { %716 = shalt.err (!%p713_p5)
}
  0x2b   :  { %60 = dma.hbm_to_vmem [thread:$0]  %s844_s3, 512, %s55_s30, [#allocation9], %s747_s20, %s747_s20, %s748_s21  }
  0x2c   :  { %737 = dma.done.wait [#allocation3], 256  }
  0x2d   :  { %738 = vsyncadd [#allocation3], 4294967040 }
  0x2e   :  { %739 = dma.done.wait [#allocation6], 512  }
  0x2f   :  { %740 = vsyncadd [#allocation6], 4294966784 }
  0x30   :  { %741 = dma.done.wait [#allocation9], 512  }
  0x31   :  { %742 = vsyncadd [#allocation9], 4294966784  ;;  %vm83_vm0 = vcmask 261120   ;;  %v76_v0 = vld [vmem:[#allocation8 + $0x18] sm:$0xff]  ;;  %v75_v1 = vld [vmem:[#allocation8 + $0x10] sm:$0xff]  ;;  %v751_v8 = vmov 0.0  }
  0x32   :  { %581 = vmatprep.subr.mxu0 %v76_v0  ;;  %v77_v2 = vld [vmem:[#allocation2] sm:$0xff]  ;;  %v74_v3 = vld [vmem:[#allocation8 + $0x8] sm:$0xff]  ;;  %v73_v4 = vld [vmem:[#allocation8] sm:$0xff]  ;;  %598 = vmatprep.subr.mxu1 %v751_v8  ;;  %vm752_vm1 = vmmov 0   ;;  %s753_s2 = smov 96   ;;  %vm353_vm2 = vcmask 64512  }
  0x33   :  { %582 = vmatpush3.msra.mxu0 %v76_v0  ;;  %589 = vmatprep.mubr.msk.f32.mxu0 %vm83_vm0, %v77_v2  ;;  %v78_v5 = vld [vmem:[#allocation2 + $0x8] sm:$0xff]  ;;  %v79_v6 = vld [vmem:[#allocation5] sm:$0xff]  ;;  %v80_v7 = vld [vmem:[#allocation5 + $0x8] sm:$0xff]  ;;  %s754_s3 = smov 64   ;;  %s755_s9 = smov [#allocation10]  }
  0x34   :  { %583 = vmatprep.subr.mxu0 %v75_v1  ;;  %600 = vmatprep.mubr.msk.f32.mxu1 %vm752_vm1, %v751_v8  ;;  %v81_v10 = vld [vmem:[#allocation7] sm:$0xff]  ;;  %v82_v11 = vld [vmem:[#allocation7 + $0x8] sm:$0xff]  ;;  %s537_s10 = sshll.u32 %s755_s9, 4  ;;  %s538_s10 = int_to_ptr.vmem [resolvable:$true] %s537_s10 }
  0x35   :  { %584 = vmatpush3.msra.mxu0 %v75_v1  ;;  %s717_s11 = scalar_lea.vmem %s538_s10, 256  ;;  %p722_p7 = scmp.lt.s32.totalorder %s538_s10, %s538_s10 }
  0x36   :  { %585 = vmatprep.subr.mxu0 %v74_v3  ;;  %p718_p6 = scmp.ne.s32.totalorder %s538_s10, %s717_s11  ;;  %p723_p8 = scmp.lt.s32.totalorder %s717_s11, %s717_s11 }
  0x37   :  { %586 = vmatpush3.msra.mxu0 %v74_v3 }
  0x38   :  { %587 = vmatprep.subr.mxu0 %v73_v4  ;;  %p724_p9 = por %p723_p8, %p722_p7 }
  0x39   :  { %588 = vmatpush3.msra.mxu0 %v73_v4 }
  0x3a   :  { %590 = vmatmul.mubr.msk.f32.vlgmr.msra.gmra.mxu0 %vm83_vm0, %v78_v5  ;;  %p725_p10 = pnand %p724_p9, %p718_p6 }
  0x3b   :  { %592 = vmatprep.mubr.msk.f32.mxu0 %vm83_vm0, %v79_v6 }
  0x3e   :  { %593 = vmatmul.mubr.msk.f32.gmra.mxu0 %vm83_vm0, %v80_v7 }
  0x3f   :  { %595 = vmatprep.mubr.msk.f32.mxu0 %vm83_vm0, %v81_v10 }
  0x42   :  { %596 = vmatmul.mubr.msk.f32.gmra.mxu0 %vm83_vm0, %v82_v11 }
  0xfa   :  { %v591_v9 = vpop.f32.mrf.mxu0 }
  0xfc   :  { %v168_v12 = vpop.f32.mrf.mxu0 }
  0xfe   :  { %v594_v13 = vpop.f32.mrf.mxu0 }
 0x100   :  { %v178_v14 = vpop.f32.mrf.mxu0 }
 0x101   :  { %198 = vrot.lane.b32.xlu0 %v178_v14, %s753_s2 }
 0x102   :  { %v597_v23 = vpop.f32.mrf.mxu0 }
 0x104   :  { %v188_v24 = vpop.f32.mrf.mxu0 }
 0x105   :  { %276 = vrot.lane.b32.xlu0 %v594_v13, %s753_s2 }
 0x173   :  { %v199_v15 = vpop.permute.xlu0 %198 }
 0x174   :  { %599 = vmatpush3.xpose.msk.msra.mxu1 %vm83_vm0, %v199_v15 }
 0x175   :  { %603 = vmatprep.subr.mxu1 %v751_v8 }
 0x177   :  { %601 = vmatmul.mubr.msk.f32.vlgmr.msra.gmra.mxu1 %vm83_vm0, %v168_v12  ;;  %v277_v16 = vpop.permute.xlu0 %276 }
 0x178   :  { %604 = vmatpush3.xpose.msk.msra.mxu1 %vm83_vm0, %v277_v16  ;;  %605 = vmatprep.mubr.msk.f32.mxu1 %vm752_vm1, %v751_v8 }
 0x179   :  { %608 = vmatprep.subr.mxu1 %v751_v8 }
 0x17b   :  { %606 = vmatmul.mubr.msk.f32.vlgmr.msra.gmra.mxu1 %vm83_vm0, %v591_v9 }
 0x17c   :  { %610 = vmatprep.mubr.msk.f32.mxu1 %vm752_vm1, %v751_v8 }
 0x237   :  { %v271_v17 = vpop.f32.mrf.mxu1 }
 0x238   :  { %v354_v18 = vsel %vm353_vm2, %v271_v17, -inf }
 0x239   :  { %355 = vmax.xlane.f32.xlu1 %v354_v18  ;;  %v602_v19 = vpop.f32.mrf.mxu1 }
 0x23b   :  { %v349_v20 = vpop.f32.mrf.mxu1 }
 0x23c   :  { %v357_v21 = vsel %vm353_vm2, %v349_v20, -inf }
 0x23d   :  { %358 = vmax.xlane.f32.xlu1 %v357_v21  ;;  %v607_v22 = vpop.f32.mrf.mxu1 }
 0x24e   :  { %377 = vrot.lane.b32.xlu1 %v188_v24, %s754_s3 }
 0x2c2   :  { %v356_v25 = vpop.xlane.xlu1 %355 }
 0x2c3   :  { %v360_v26 = vsub.f32 %v271_v17, %v356_v25 }
 0x2c5   :  { %v362_v27 = vmul.f32 1.442695, %v360_v26 }
 0x2c6   :  { %v359_v28 = vpop.xlane.xlu1 %358 }
 0x2c7   :  { %629 = vpow2.f32 %v362_v27  ;;  %v361_v29 = vsub.f32 %v349_v20, %v359_v28 }
 0x2c9   :  { %v364_v30 = vmul.f32 1.442695, %v361_v29 }
 0x2ca   :  { %v378_v31 = vpop.permute.xlu1 %377 }
 0x2cb   :  { %631 = vpow2.f32 %v364_v30  ;;  %609 = vmatpush3.msra.mxu1 %v378_v31 }
 0x2cc   :  { %613 = vmatprep.subr.mxu1 %v751_v8 }
 0x2d4   :  { %v630_v32 = vpop.eup %629 }
 0x2d5   :  { %v366_v33 = vsel %vm353_vm2, %v630_v32, 0.0 }
 0x2d6   :  { %367 = vadd.xlane.f32.xlu0 %v366_v33 }
 0x2d8   :  { %v632_v34 = vpop.eup %631 }
 0x2d9   :  { %v369_v35 = vsel %vm353_vm2, %v632_v34, 0.0 }
 0x2da   :  { %370 = vadd.xlane.f32.xlu1 %v369_v35 }
 0x2eb   :  { %454 = vrot.lane.b32.xlu1 %v597_v23, %s754_s3 }
 0x35f   :  { %v368_v36 = vpop.xlane.xlu0 %367 }
 0x360   :  { %633 = vrcp.f32 %v368_v36 }
 0x363   :  { %v371_v37 = vpop.xlane.xlu1 %370 }
 0x364   :  { %635 = vrcp.f32 %v371_v37 }
 0x367   :  { %v455_v40 = vpop.permute.xlu1 %454 }
 0x36d   :  { %v634_v38 = vpop.eup %633 }
 0x36e   :  { %v374_v39 = vmul.f32 %v634_v38, %v630_v32 }
 0x370   :  { %611 = vmatmul.mubr.msk.f32.vlgmr.msra.gmra.mxu1 %vm353_vm2, %v374_v39 }
 0x371   :  { %v636_v41 = vpop.eup %635  ;;  %614 = vmatpush3.msra.mxu1 %v455_v40  ;;  %615 = vmatprep.mubr.msk.f32.mxu1 %vm752_vm1, %v751_v8 }
 0x372   :  { %v375_v42 = vmul.f32 %v636_v41, %v632_v34 }
 0x374   :  { %616 = vmatmul.mubr.msk.f32.vlgmr.msra.gmra.mxu1 %vm353_vm2, %v375_v42 }
 0x430   :  { %v449_v43 = vpop.f32.mrf.mxu1 }
 0x431   :  { %530 = vst.msk [vmem:[#allocation10] sm:$0xff] %vm83_vm0, %v449_v43 }
 0x432   :  { %v612_v44 = vpop.f32.mrf.mxu1 }
 0x434   :  { %v526_v45 = vpop.f32.mrf.mxu1 }
 0x435   :  { %531 = vst.msk [vmem:[#allocation10 + $0x8] sm:$0xff] %vm83_vm0, %v526_v45 }
 0x436   :  { %v617_v46 = vpop.f32.mrf.mxu1 }
 0x437   :  { %728 = shalt.err (!%p725_p10)
}
 0x438   :  { %543 = dma.vmem_to_hbm [thread:$0]  %s538_s10, 256, %s845_s4, [#allocation4], %s747_s20, %s747_s20, %s748_s21  }
 0x439   :  { %743 = dma.done.wait [#allocation4], 256  }
 0x43a   :  { %744 = vsyncadd [#allocation4], 4294967040 }
 0x43b   :  { %547 = vsyncpa [#allocation3], 1 }
 0x43c   :  { %548 = vsyncpa [#allocation6], 1 }
 0x43d   :  { %549 = vsyncpa [#allocation9], 1 }
 0x43e   :  { %550 = vsyncpa [#allocation4], 1 }

</bundles_post_ra>
